<compile_context>
chip_gen: v6e
topology: v6e:2x2x1
jax: 0.10.0
libtpu: 0.0.40
codegen_flags: <defaults>
</compile_context>

<pallas_src>
import jax
import jax.numpy as jnp
from jax.experimental import pallas as pl
from jax.experimental.pallas import tpu as pltpu


_NUM_LAYERS = 6
_LANE = 128
_SUBLANE = 16          # sublane-pack multiple (bf16-safe; also fine for f32)
_TB_CAP = 512          # max batch-tile rows; weights stay resident across tiles


def _round_up(x, m):
    return (x + m - 1) // m * m


# --------------------------------------------------------------------------- #
# One-time parameter packing (hoisted out of the per-call path).
# --------------------------------------------------------------------------- #
def pack_params(params, size_input, operand_dtype=None):
    """Pack six PyTorch-layout (W, b) pairs into two padded arrays, ONCE.

    Returns (w_packed, b_packed, meta). Call at model-init time: the packing
    moves more HBM bytes than the kernel itself at small sizes.
    """
    assert len(params) == _NUM_LAYERS
    in_dims = [size_input] + [w.shape[0] for (w, _) in params[:-1]]
    out_dims = [w.shape[0] for (w, _) in params]
    for i, (w, _) in enumerate(params):
        assert w.shape == (out_dims[i], in_dims[i]), "PyTorch (out, in) layout expected"

    # Per-layer lane padding (multiples of 128); static slices inside the
    # kernel keep each layer's MXU work minimal when widths are heterogeneous.
    k_pads = tuple(_round_up(d, _LANE) for d in in_dims)
    n_pads = tuple(_round_up(d, _LANE) for d in out_dims)
    k_max, n_max = max(k_pads), max(n_pads)

    if operand_dtype is None:
        # f32 MXU operands are essentially free at small padded dims and keep
        # the result bit-close to the f32 reference; use bf16 only when the
        # dims are large enough for operand width / weight traffic to matter.
        operand_dtype = jnp.float32 if max(k_max, n_max) <= 256 else jnp.bfloat16
    operand_dtype = jnp.dtype(operand_dtype)

    # NOTE(correctness): padded weight rows/cols AND padded bias lanes MUST be
    # exactly zero.  Ghost input lanes carry sigmoid(0)=0.5 after every hidden
    # layer and are annihilated only because the next layer's padded weight
    # rows are zero.  They are zero by construction (jnp.zeros base) -- never
    # alias or partially overwrite these buffers.
    w_packed = jnp.zeros((_NUM_LAYERS, k_max, n_max), operand_dtype)
    b_packed = jnp.zeros((_NUM_LAYERS, 1, n_max), jnp.float32)
    for i, (w, b) in enumerate(params):
        wt = jnp.asarray(w, jnp.float32).T                      # (in, out)
        w_packed = w_packed.at[i, :in_dims[i], :out_dims[i]].set(
            wt.astype(operand_dtype))
        b_packed = b_packed.at[i, 0, :out_dims[i]].set(jnp.asarray(b, jnp.float32))

    meta = dict(size_input=size_input, num_class=out_dims[-1],
                k_pads=k_pads, n_pads=n_pads, k_max=k_max, n_max=n_max,
                operand_dtype=operand_dtype)
    return w_packed, b_packed, meta


# --------------------------------------------------------------------------- #
# Kernel.
# --------------------------------------------------------------------------- #
def _make_kernel(k_pads, n_pads, op_dtype):
    def kernel(x_ref, w_ref, b_ref, out_ref):
        """Fused forward for one batch tile.

        x_ref  : (TB, k_pads[0])        operand dtype, lane-padded activations
        w_ref  : (6, k_max, n_max)      operand dtype, packed (in, out) weights
        b_ref  : (6, 1, n_max)          f32 packed biases
        out_ref: (TB, n_pads[-1])       f32 lane-padded output tile
        """
        h = x_ref[...]
        for i in range(_NUM_LAYERS):
            k, n = k_pads[i], n_pads[i]
            # Static ref slices are free; per-layer padded dims keep MXU work
            # minimal.  Accumulate in f32 on the MXU.
            acc = jnp.dot(h, w_ref[i, :k, :n], preferred_element_type=jnp.float32)
            acc = acc + b_ref[i, :, :n]                    # (1, n) broadcast, f32
            if i < _NUM_LAYERS - 1:
                # Element-wise math stays f32 (v5e VPU/EUP have no bf16 path).
                h = jax.nn.sigmoid(acc).astype(op_dtype)
            else:
                out_ref[...] = acc.astype(out_ref.dtype)
    return kernel


def _choose_batch_tiling(batch):
    """(TB, batch_pad): TB multiple of 16, capped at _TB_CAP; split >=2 ways
    for v7x's two TensorCores when the batch is large enough to matter."""
    bp = _round_up(batch, _SUBLANE)
    if bp <= _TB_CAP:
        tb = _round_up(pl.cdiv(bp, 2), _SUBLANE) if bp >= 256 else bp
    else:
        tb = _TB_CAP
    bp = _round_up(batch, tb)
    return tb, bp


# --------------------------------------------------------------------------- #
# Jitted forward builder.
# --------------------------------------------------------------------------- #
def build_forward(meta):
    """Returns jitted forward(x, w_packed, b_packed) -> (batch, num_class) f32."""
    size_input = meta["size_input"]
    num_class = meta["num_class"]
    k_pads, n_pads = meta["k_pads"], meta["n_pads"]
    k_max, n_max = meta["k_max"], meta["n_max"]
    op_dtype = meta["operand_dtype"]
    op_bytes = op_dtype.itemsize
    kernel = _make_kernel(k_pads, n_pads, op_dtype)

    def _forward(x, w_packed, b_packed):
        batch = x.shape[0]
        tb, bp = _choose_batch_tiling(batch)
        grid = (bp // tb,)

        # Only the activation pad happens per call (fuses under jit).
        x_p = jnp.zeros((bp, k_pads[0]), op_dtype)
        x_p = x_p.at[:batch, :size_input].set(x.astype(op_dtype))

        # Explicit VMEM budget: resident weights/biases (single- or double-
        # buffered), double-buffered x/out tiles, plus headroom.  Scoped VMEM
        # defaults (16/32 MiB) would otherwise choke the resident-weight
        # strategy as dims grow; cap at v7x's 64 MiB physical VMEM.
        w_bytes = _NUM_LAYERS * k_max * n_max * op_bytes
        b_bytes = _NUM_LAYERS * n_max * 4
        w_buffers = 1 if w_bytes > (8 << 20) else 2
        io_bytes = 2 * tb * k_pads[0] * op_bytes + 2 * tb * n_pads[-1] * 4
        vmem_limit = int(1.5 * (w_buffers * w_bytes + 2 * b_bytes + io_bytes)) + (2 << 20)
        vmem_limit = max(16 << 20, min(vmem_limit, 64 << 20))

        # Constant index_map => weights/biases never change between grid steps;
        # when the slab is large (v7x 64 MiB guard) drop to single buffering.
        resident_mode = pl.Buffered(1) if w_buffers == 1 else None

        flops = 2 * bp * sum(k * n for k, n in zip(k_pads, n_pads))
        cost = pl.CostEstimate(
            flops=flops,
            transcendentals=bp * sum(n_pads[:-1]),
            bytes_accessed=(bp * k_pads[0] * op_bytes + w_bytes + b_bytes
                            + bp * n_pads[-1] * 4),
        )

        out_p = pl.pallas_call(
            kernel,
            out_shape=jax.ShapeDtypeStruct((bp, n_pads[-1]), jnp.float32),
            grid=grid,
            in_specs=[
                pl.BlockSpec((tb, k_pads[0]), lambda i: (i, 0)),        # batch tile
                pl.BlockSpec((_NUM_LAYERS, k_max, n_max),               # resident W
                             lambda i: (0, 0, 0), pipeline_mode=resident_mode),
                pl.BlockSpec((_NUM_LAYERS, 1, n_max),                   # resident b
                             lambda i: (0, 0, 0), pipeline_mode=resident_mode),
            ],
            out_specs=pl.BlockSpec((tb, n_pads[-1]), lambda i: (i, 0)),
            compiler_params=pltpu.CompilerParams(
                dimension_semantics=("parallel",),
                vmem_limit_bytes=vmem_limit),
            cost_estimate=cost,
        )(x_p, w_packed, b_packed)

        # Padded batch rows / ghost lanes hold garbage; always slice here.
        return out_p[:batch, :num_class]

    return jax.jit(_forward)


# --------------------------------------------------------------------------- #
# Reference + init helpers.
# --------------------------------------------------------------------------- #
def _init_linear(key, out_features, in_features):
    """PyTorch-style uniform(-1/sqrt(fan_in), 1/sqrt(fan_in)) init."""
    kw, kb = jax.random.split(key)
    bound = 1.0 / jnp.sqrt(jnp.float32(in_features))
    w = jax.random.uniform(kw, (out_features, in_features), jnp.float32,
                           minval=-bound, maxval=bound)
    b = jax.random.uniform(kb, (out_features,), jnp.float32,
                           minval=-bound, maxval=bound)
    return w, b


def _reference_forward(x, params):
    h = x
    for i, (w, b) in enumerate(params):
        h = h @ w.T + b
        if i < len(params) - 1:
            h = jax.nn.sigmoid(h)
    return h


if __name__ == "__main__":
    size_input = 32
    size_hidden = 32
    num_class = 8
    batch = 8

    key = jax.random.PRNGKey(0)
    keys = jax.random.split(key, 7)

    x = jax.random.normal(keys[0], (batch, size_input), jnp.float32)

    layer_dims = [
        (size_hidden, size_input),
        (size_hidden, size_hidden),
        (size_hidden, size_hidden),
        (size_hidden, size_hidden),
        (size_hidden, size_hidden),
        (num_class, size_hidden),
    ]
    params = [_init_linear(keys[i + 1], o, i_) for i, (o, i_) in enumerate(layer_dims)]

    # Pack once at init (outside the per-call path), build the jitted forward.
    w_packed, b_packed, meta = pack_params(params, size_input)
    forward = build_forward(meta)

    out = forward(x, w_packed, b_packed)
    out = jax.block_until_ready(out)

    ref = _reference_forward(x, params)
    assert out.shape == (batch, num_class)
    err = float(jnp.max(jnp.abs(out - ref)))
    # f32 MXU operands at this size -> error should be tiny; tolerance still
    # covers a bf16-operand fallback at large dims.
    assert jnp.allclose(out, ref, atol=1e-2, rtol=1e-2), f"max abs err {err}"

    print("KERNEL_OK")
</pallas_src>

<mosaic_0001>
module attributes {stable_mosaic.version = 11 : i64} {
  func.func @kernel(%arg0: i32, %arg1: memref<16x128xf32, #tpu.memory_space<vmem>>, %arg2: memref<6x128x128xf32, #tpu.memory_space<vmem>>, %arg3: memref<6x1x128xf32, #tpu.memory_space<vmem>>, %arg4: memref<16x128xf32, #tpu.memory_space<vmem>>) attributes {dimension_semantics = [#tpu.dimension_semantics<parallel>], iteration_bounds = array<i64: 1>, scalar_prefetch = 0 : i64, scratch_operands = 0 : i64, tpu.core_type = #tpu.core_type<tc>, window_params = [{transform_indices = @transform_0, window_bounds = array<i64: 16, 128>}, {pipeline_mode = #tpu.pipeline_mode<synchronous>, transform_indices = @transform_1, window_bounds = array<i64: 6, 128, 128>}, {pipeline_mode = #tpu.pipeline_mode<synchronous>, transform_indices = @transform_2, window_bounds = array<i64: 6, 1, 128>}, {transform_indices = @transform_3, window_bounds = array<i64: 16, 128>}]} {
    %c0 = arith.constant 0 : index
    %c0_0 = arith.constant 0 : index
    %0 = vector.load %arg1[%c0, %c0_0] : memref<16x128xf32, #tpu.memory_space<vmem>>, vector<16x128xf32>
    %c0_1 = arith.constant 0 : index
    %c0_2 = arith.constant 0 : index
    %c0_3 = arith.constant 0 : index
    %1 = vector.load %arg2[%c0_1, %c0_2, %c0_3] : memref<6x128x128xf32, #tpu.memory_space<vmem>>, vector<1x128x128xf32>
    %2 = vector.shape_cast %1 : vector<1x128x128xf32> to vector<128x128xf32>
    %cst = arith.constant dense<0.000000e+00> : vector<16x128xf32>
    %3 = tpu.matmul %0, %2, %cst {dimension_numbers = #tpu.dot_dimension_numbers<[1], [0], [0], [1], [0, 0, 1, 1], [], []>} : vector<16x128xf32>, vector<128x128xf32>, vector<16x128xf32> -> vector<16x128xf32>
    %c0_4 = arith.constant 0 : index
    %c0_5 = arith.constant 0 : index
    %c0_6 = arith.constant 0 : index
    %4 = vector.load %arg3[%c0_4, %c0_5, %c0_6] : memref<6x1x128xf32, #tpu.memory_space<vmem>>, vector<1x1x128xf32>
    %5 = vector.shape_cast %4 : vector<1x1x128xf32> to vector<1x128xf32>
    %6 = vector.broadcast %5 : vector<1x128xf32> to vector<16x128xf32>
    %7 = arith.addf %3, %6 : vector<16x128xf32>
    %8 = arith.negf %7 : vector<16x128xf32>
    %9 = math.exp %8 : vector<16x128xf32>
    %cst_7 = arith.constant 1.000000e+00 : f32
    %10 = vector.broadcast %cst_7 : f32 to vector<16x128xf32>
    %11 = arith.addf %10, %9 : vector<16x128xf32>
    %12 = arith.divf %10, %11 : vector<16x128xf32>
    %c1 = arith.constant 1 : index
    %c0_8 = arith.constant 0 : index
    %c0_9 = arith.constant 0 : index
    %13 = vector.load %arg2[%c1, %c0_8, %c0_9] : memref<6x128x128xf32, #tpu.memory_space<vmem>>, vector<1x128x128xf32>
    %14 = vector.shape_cast %13 : vector<1x128x128xf32> to vector<128x128xf32>
    %cst_10 = arith.constant dense<0.000000e+00> : vector<16x128xf32>
    %15 = tpu.matmul %12, %14, %cst_10 {dimension_numbers = #tpu.dot_dimension_numbers<[1], [0], [0], [1], [0, 0, 1, 1], [], []>} : vector<16x128xf32>, vector<128x128xf32>, vector<16x128xf32> -> vector<16x128xf32>
    %c1_11 = arith.constant 1 : index
    %c0_12 = arith.constant 0 : index
    %c0_13 = arith.constant 0 : index
    %16 = vector.load %arg3[%c1_11, %c0_12, %c0_13] : memref<6x1x128xf32, #tpu.memory_space<vmem>>, vector<1x1x128xf32>
    %17 = vector.shape_cast %16 : vector<1x1x128xf32> to vector<1x128xf32>
    %18 = vector.broadcast %17 : vector<1x128xf32> to vector<16x128xf32>
    %19 = arith.addf %15, %18 : vector<16x128xf32>
    %20 = arith.negf %19 : vector<16x128xf32>
    %21 = math.exp %20 : vector<16x128xf32>
    %cst_14 = arith.constant 1.000000e+00 : f32
    %22 = vector.broadcast %cst_14 : f32 to vector<16x128xf32>
    %23 = arith.addf %22, %21 : vector<16x128xf32>
    %24 = arith.divf %22, %23 : vector<16x128xf32>
    %c2 = arith.constant 2 : index
    %c0_15 = arith.constant 0 : index
    %c0_16 = arith.constant 0 : index
    %25 = vector.load %arg2[%c2, %c0_15, %c0_16] : memref<6x128x128xf32, #tpu.memory_space<vmem>>, vector<1x128x128xf32>
    %26 = vector.shape_cast %25 : vector<1x128x128xf32> to vector<128x128xf32>
    %cst_17 = arith.constant dense<0.000000e+00> : vector<16x128xf32>
    %27 = tpu.matmul %24, %26, %cst_17 {dimension_numbers = #tpu.dot_dimension_numbers<[1], [0], [0], [1], [0, 0, 1, 1], [], []>} : vector<16x128xf32>, vector<128x128xf32>, vector<16x128xf32> -> vector<16x128xf32>
    %c2_18 = arith.constant 2 : index
    %c0_19 = arith.constant 0 : index
    %c0_20 = arith.constant 0 : index
    %28 = vector.load %arg3[%c2_18, %c0_19, %c0_20] : memref<6x1x128xf32, #tpu.memory_space<vmem>>, vector<1x1x128xf32>
    %29 = vector.shape_cast %28 : vector<1x1x128xf32> to vector<1x128xf32>
    %30 = vector.broadcast %29 : vector<1x128xf32> to vector<16x128xf32>
    %31 = arith.addf %27, %30 : vector<16x128xf32>
    %32 = arith.negf %31 : vector<16x128xf32>
    %33 = math.exp %32 : vector<16x128xf32>
    %cst_21 = arith.constant 1.000000e+00 : f32
    %34 = vector.broadcast %cst_21 : f32 to vector<16x128xf32>
    %35 = arith.addf %34, %33 : vector<16x128xf32>
    %36 = arith.divf %34, %35 : vector<16x128xf32>
    %c3 = arith.constant 3 : index
    %c0_22 = arith.constant 0 : index
    %c0_23 = arith.constant 0 : index
    %37 = vector.load %arg2[%c3, %c0_22, %c0_23] : memref<6x128x128xf32, #tpu.memory_space<vmem>>, vector<1x128x128xf32>
    %38 = vector.shape_cast %37 : vector<1x128x128xf32> to vector<128x128xf32>
    %cst_24 = arith.constant dense<0.000000e+00> : vector<16x128xf32>
    %39 = tpu.matmul %36, %38, %cst_24 {dimension_numbers = #tpu.dot_dimension_numbers<[1], [0], [0], [1], [0, 0, 1, 1], [], []>} : vector<16x128xf32>, vector<128x128xf32>, vector<16x128xf32> -> vector<16x128xf32>
    %c3_25 = arith.constant 3 : index
    %c0_26 = arith.constant 0 : index
    %c0_27 = arith.constant 0 : index
    %40 = vector.load %arg3[%c3_25, %c0_26, %c0_27] : memref<6x1x128xf32, #tpu.memory_space<vmem>>, vector<1x1x128xf32>
    %41 = vector.shape_cast %40 : vector<1x1x128xf32> to vector<1x128xf32>
    %42 = vector.broadcast %41 : vector<1x128xf32> to vector<16x128xf32>
    %43 = arith.addf %39, %42 : vector<16x128xf32>
    %44 = arith.negf %43 : vector<16x128xf32>
    %45 = math.exp %44 : vector<16x128xf32>
    %cst_28 = arith.constant 1.000000e+00 : f32
    %46 = vector.broadcast %cst_28 : f32 to vector<16x128xf32>
    %47 = arith.addf %46, %45 : vector<16x128xf32>
    %48 = arith.divf %46, %47 : vector<16x128xf32>
    %c4 = arith.constant 4 : index
    %c0_29 = arith.constant 0 : index
    %c0_30 = arith.constant 0 : index
    %49 = vector.load %arg2[%c4, %c0_29, %c0_30] : memref<6x128x128xf32, #tpu.memory_space<vmem>>, vector<1x128x128xf32>
    %50 = vector.shape_cast %49 : vector<1x128x128xf32> to vector<128x128xf32>
    %cst_31 = arith.constant dense<0.000000e+00> : vector<16x128xf32>
    %51 = tpu.matmul %48, %50, %cst_31 {dimension_numbers = #tpu.dot_dimension_numbers<[1], [0], [0], [1], [0, 0, 1, 1], [], []>} : vector<16x128xf32>, vector<128x128xf32>, vector<16x128xf32> -> vector<16x128xf32>
    %c4_32 = arith.constant 4 : index
    %c0_33 = arith.constant 0 : index
    %c0_34 = arith.constant 0 : index
    %52 = vector.load %arg3[%c4_32, %c0_33, %c0_34] : memref<6x1x128xf32, #tpu.memory_space<vmem>>, vector<1x1x128xf32>
    %53 = vector.shape_cast %52 : vector<1x1x128xf32> to vector<1x128xf32>
    %54 = vector.broadcast %53 : vector<1x128xf32> to vector<16x128xf32>
    %55 = arith.addf %51, %54 : vector<16x128xf32>
    %56 = arith.negf %55 : vector<16x128xf32>
    %57 = math.exp %56 : vector<16x128xf32>
    %cst_35 = arith.constant 1.000000e+00 : f32
    %58 = vector.broadcast %cst_35 : f32 to vector<16x128xf32>
    %59 = arith.addf %58, %57 : vector<16x128xf32>
    %60 = arith.divf %58, %59 : vector<16x128xf32>
    %c5 = arith.constant 5 : index
    %c0_36 = arith.constant 0 : index
    %c0_37 = arith.constant 0 : index
    %61 = vector.load %arg2[%c5, %c0_36, %c0_37] : memref<6x128x128xf32, #tpu.memory_space<vmem>>, vector<1x128x128xf32>
    %62 = vector.shape_cast %61 : vector<1x128x128xf32> to vector<128x128xf32>
    %cst_38 = arith.constant dense<0.000000e+00> : vector<16x128xf32>
    %63 = tpu.matmul %60, %62, %cst_38 {dimension_numbers = #tpu.dot_dimension_numbers<[1], [0], [0], [1], [0, 0, 1, 1], [], []>} : vector<16x128xf32>, vector<128x128xf32>, vector<16x128xf32> -> vector<16x128xf32>
    %c5_39 = arith.constant 5 : index
    %c0_40 = arith.constant 0 : index
    %c0_41 = arith.constant 0 : index
    %64 = vector.load %arg3[%c5_39, %c0_40, %c0_41] : memref<6x1x128xf32, #tpu.memory_space<vmem>>, vector<1x1x128xf32>
    %65 = vector.shape_cast %64 : vector<1x1x128xf32> to vector<1x128xf32>
    %66 = vector.broadcast %65 : vector<1x128xf32> to vector<16x128xf32>
    %67 = arith.addf %63, %66 : vector<16x128xf32>
    %c0_42 = arith.constant 0 : index
    %c0_43 = arith.constant 0 : index
    %68 = vector.load %arg4[%c0_42, %c0_43] : memref<16x128xf32, #tpu.memory_space<vmem>>, vector<16x128xf32>
    tpu.vector_store %arg4[%c0_42, %c0_43], %67 {strides = array<i32>} : memref<16x128xf32, #tpu.memory_space<vmem>>, vector<16x128xf32>,
    return
  }
  func.func @transform_0(%arg0: i32) -> (i32, i32) {
    %c0_i32 = arith.constant 0 : i32
    %c0_i32_0 = arith.constant 0 : i32
    return %arg0, %c0_i32 : i32, i32
  }
  func.func @transform_1(%arg0: i32) -> (i32, i32, i32) {
    %c0_i32 = arith.constant 0 : i32
    %c0_i32_0 = arith.constant 0 : i32
    %c0_i32_1 = arith.constant 0 : i32
    %c0_i32_2 = arith.constant 0 : i32
    return %c0_i32, %c0_i32_0, %c0_i32_1 : i32, i32, i32
  }
  func.func @transform_2(%arg0: i32) -> (i32, i32, i32) {
    %c0_i32 = arith.constant 0 : i32
    %c0_i32_0 = arith.constant 0 : i32
    %c0_i32_1 = arith.constant 0 : i32
    %c0_i32_2 = arith.constant 0 : i32
    return %c0_i32, %c0_i32_0, %c0_i32_1 : i32, i32, i32
  }
  func.func @transform_3(%arg0: i32) -> (i32, i32) {
    %c0_i32 = arith.constant 0 : i32
    %c0_i32_0 = arith.constant 0 : i32
    return %arg0, %c0_i32 : i32, i32
  }
}

</mosaic_0001>

<bundles_post_ra>
// kernel: _forward.1
= control target key start
LH: loop header
LB: loop body
LE: loop exit
PB: predicated region body
PF: predicated region fallthrough
CT: control target
= control target key end

     0   :  { %8 = vsyncpa [#allocation3], 0  ;;  %s1099_s12 = smov [#allocation2]   ;;  %s1155_s0 = inlined_call_operand.vmem [shape: f32[16,128], index: 0, kind: input, shape index: {}]   ;;  %s1156_s1 = inlined_call_operand.hbm [shape: f32[6,128,128], index: 1, kind: input, shape index: {}]   ;;  %s1157_s2 = inlined_call_operand.vmem [shape: f32[6,1,128], index: 2, kind: input, shape index: {}]   ;;  %s1158_s3 = inlined_call_operand.vmem [shape: f32[16,128], index: 3, kind: output, shape index: {}]  }
   0x1   :  { %s16_s13 = sshll.u32 %s1099_s12, 4  ;;  %s17_s13 = int_to_ptr.vmem [resolvable:$true] %s16_s13 }
   0x2   :  { %s1085_s14 = scalar_lea.vmem %s17_s13, 12288  ;;  %p1090_p1 = scmp.lt.s32.totalorder %s17_s13, %s17_s13 }
   0x3   :  { %p1086_p0 = scmp.ne.s32.totalorder %s17_s13, %s1085_s14  ;;  %p1091_p2 = scmp.lt.s32.totalorder %s1085_s14, %s1085_s14 }
   0x5   :  { %p1092_p3 = por %p1091_p2, %p1090_p1 }
   0x7   :  { %p1093_p4 = pnand %p1092_p3, %p1086_p0 }
   0x9   :  { %1096 = shalt.err (!%p1093_p4)
}
   0xa   :  { %s1100_s15 = smov 128   ;;  %s1101_s16 = smov 8  }
   0xb   :  { %22 = dma.hbm_to_vmem [thread:$0]  %s1156_s1, 12288, %s17_s13, [#allocation3], %s1100_s15, %s1100_s15, %s1101_s16  }
   0xc   :  { %1097 = dma.done.wait [#allocation3], 12288  }
   0xd   :  { %1098 = vsyncadd [#allocation3], 4294955008  ;;  %v45_v0 = vld [vmem:[#allocation2 + $0x78] sm:$0xff]  ;;  %v44_v1 = vld [vmem:[#allocation2 + $0x70] sm:$0xff] }
   0xe   :  { %824 = vmatprep.subr.mxu0 %v45_v0  ;;  %v43_v2 = vld [vmem:[#allocation2 + $0x68] sm:$0xff]  ;;  %v42_v3 = vld [vmem:[#allocation2 + $0x60] sm:$0xff]  ;;  %v41_v5 = vld [vmem:[#allocation2 + $0x58] sm:$0xff] }
   0xf   :  { %825 = vmatpush3.msra.mxu0 %v45_v0  ;;  %v28_v4 = vld [vmem:[%s1155_s0] sm:$0xff]  ;;  %v40_v6 = vld [vmem:[#allocation2 + $0x50] sm:$0xff]  ;;  %v39_v7 = vld [vmem:[#allocation2 + $0x48] sm:$0xff] }
  0x10   :  { %826 = vmatprep.subr.mxu0 %v44_v1  ;;  %856 = vmatprep.mubr.f32.mxu0 %v28_v4  ;;  %v38_v8 = vld [vmem:[#allocation2 + $0x40] sm:$0xff]  ;;  %v37_v9 = vld [vmem:[#allocation2 + $0x38] sm:$0xff]  ;;  %v36_v10 = vld [vmem:[#allocation2 + $0x30] sm:$0xff] }
  0x11   :  { %827 = vmatpush3.msra.mxu0 %v44_v1  ;;  %v35_v11 = vld [vmem:[#allocation2 + $0x28] sm:$0xff]  ;;  %v34_v12 = vld [vmem:[#allocation2 + $0x20] sm:$0xff]  ;;  %v33_v13 = vld [vmem:[#allocation2 + $0x18] sm:$0xff] }
  0x12   :  { %828 = vmatprep.subr.mxu0 %v43_v2  ;;  %v32_v14 = vld [vmem:[#allocation2 + $0x10] sm:$0xff]  ;;  %v31_v15 = vld [vmem:[#allocation2 + $0x8] sm:$0xff]  ;;  %v30_v16 = vld [vmem:[#allocation2] sm:$0xff] }
  0x13   :  { %829 = vmatpush3.msra.mxu0 %v43_v2  ;;  %v29_v17 = vld [vmem:[%s1155_s0 + $0x8] sm:$0xff]  ;;  %v156_v18 = vld [vmem:[#allocation2 + $0xf8] sm:$0xff]  ;;  %v155_v19 = vld [vmem:[#allocation2 + $0xf0] sm:$0xff] }
  0x14   :  { %830 = vmatprep.subr.mxu0 %v42_v3  ;;  %859 = vmatprep.subr.mxu1 %v156_v18  ;;  %v154_v20 = vld [vmem:[#allocation2 + $0xe8] sm:$0xff]  ;;  %v153_v21 = vld [vmem:[#allocation2 + $0xe0] sm:$0xff]  ;;  %v152_v22 = vld [vmem:[#allocation2 + $0xd8] sm:$0xff] }
  0x15   :  { %831 = vmatpush3.msra.mxu0 %v42_v3  ;;  %860 = vmatpush3.msra.mxu1 %v156_v18  ;;  %v151_v23 = vld [vmem:[#allocation2 + $0xd0] sm:$0xff]  ;;  %v150_v24 = vld [vmem:[#allocation2 + $0xc8] sm:$0xff]  ;;  %v149_v25 = vld [vmem:[#allocation2 + $0xc0] sm:$0xff] }
  0x16   :  { %832 = vmatprep.subr.mxu0 %v41_v5  ;;  %861 = vmatprep.subr.mxu1 %v155_v19  ;;  %v148_v26 = vld [vmem:[#allocation2 + $0xb8] sm:$0xff]  ;;  %v147_v27 = vld [vmem:[#allocation2 + $0xb0] sm:$0xff]  ;;  %v146_v28 = vld [vmem:[#allocation2 + $0xa8] sm:$0xff] }
  0x17   :  { %833 = vmatpush3.msra.mxu0 %v41_v5  ;;  %862 = vmatpush3.msra.mxu1 %v155_v19  ;;  %v145_v29 = vld [vmem:[#allocation2 + $0xa0] sm:$0xff]  ;;  %v144_v30 = vld [vmem:[#allocation2 + $0x98] sm:$0xff]  ;;  %v143_v31 = vld [vmem:[#allocation2 + $0x90] sm:$0xff] }
  0x18   :  { %834 = vmatprep.subr.mxu0 %v40_v6  ;;  %863 = vmatprep.subr.mxu1 %v154_v20  ;;  %v142_v32 = vld [vmem:[#allocation2 + $0x88] sm:$0xff]  ;;  %v141_v33 = vld [vmem:[#allocation2 + $0x80] sm:$0xff]  ;;  %v268_v47 = vld [vmem:[#allocation2 + $0x178] sm:$0xff] }
  0x19   :  { %835 = vmatpush3.msra.mxu0 %v40_v6  ;;  %864 = vmatpush3.msra.mxu1 %v154_v20  ;;  %v695_v34 = vld [vmem:[%s1157_s2] ss:$0 sm:$0xff]  ;;  %v267_v48 = vld [vmem:[#allocation2 + $0x170] sm:$0xff]  ;;  %v266_v49 = vld [vmem:[#allocation2 + $0x168] sm:$0xff] }
  0x1a   :  { %836 = vmatprep.subr.mxu0 %v39_v7  ;;  %865 = vmatprep.subr.mxu1 %v153_v21  ;;  %v265_v50 = vld [vmem:[#allocation2 + $0x160] sm:$0xff]  ;;  %v264_v51 = vld [vmem:[#allocation2 + $0x158] sm:$0xff]  ;;  %v263_v52 = vld [vmem:[#allocation2 + $0x150] sm:$0xff] }
  0x1b   :  { %837 = vmatpush3.msra.mxu0 %v39_v7  ;;  %866 = vmatpush3.msra.mxu1 %v153_v21  ;;  %v262_v53 = vld [vmem:[#allocation2 + $0x148] sm:$0xff]  ;;  %v261_v54 = vld [vmem:[#allocation2 + $0x140] sm:$0xff]  ;;  %v260_v55 = vld [vmem:[#allocation2 + $0x138] sm:$0xff] }
  0x1c   :  { %838 = vmatprep.subr.mxu0 %v38_v8  ;;  %867 = vmatprep.subr.mxu1 %v152_v22  ;;  %v259_v56 = vld [vmem:[#allocation2 + $0x130] sm:$0xff]  ;;  %v258_v57 = vld [vmem:[#allocation2 + $0x128] sm:$0xff]  ;;  %v257_v58 = vld [vmem:[#allocation2 + $0x120] sm:$0xff] }
  0x1d   :  { %839 = vmatpush3.msra.mxu0 %v38_v8  ;;  %868 = vmatpush3.msra.mxu1 %v152_v22  ;;  %v256_v59 = vld [vmem:[#allocation2 + $0x118] sm:$0xff]  ;;  %v255_v60 = vld [vmem:[#allocation2 + $0x110] sm:$0xff]  ;;  %v254_v61 = vld [vmem:[#allocation2 + $0x108] sm:$0xff] }
  0x1e   :  { %840 = vmatprep.subr.mxu0 %v37_v9  ;;  %869 = vmatprep.subr.mxu1 %v151_v23  ;;  %v253_v62 = vld [vmem:[#allocation2 + $0x100] sm:$0xff]  ;;  %v374_v18 = vld [vmem:[#allocation2 + $0x1c8] sm:$0xff]  ;;  %v372_v20 = vld [vmem:[#allocation2 + $0x1b8] sm:$0xff] }
  0x1f   :  { %841 = vmatpush3.msra.mxu0 %v37_v9  ;;  %870 = vmatpush3.msra.mxu1 %v151_v23  ;;  %v699_v63 = vld [vmem:[%s1157_s2 + $0x1] ss:$0 sm:$0xff]  ;;  %v371_v21 = vld [vmem:[#allocation2 + $0x1b0] sm:$0xff]  ;;  %v370_v22 = vld [vmem:[#allocation2 + $0x1a8] sm:$0xff] }
  0x20   :  { %842 = vmatprep.subr.mxu0 %v36_v10  ;;  %871 = vmatprep.subr.mxu1 %v150_v24  ;;  %v373_v19 = vld [vmem:[#allocation2 + $0x1c0] sm:$0xff] }
  0x21   :  { %843 = vmatpush3.msra.mxu0 %v36_v10  ;;  %872 = vmatpush3.msra.mxu1 %v150_v24  ;;  %v369_v23 = vld [vmem:[#allocation2 + $0x1a0] sm:$0xff]  ;;  %v368_v24 = vld [vmem:[#allocation2 + $0x198] sm:$0xff] }
  0x22   :  { %844 = vmatprep.subr.mxu0 %v35_v11  ;;  %873 = vmatprep.subr.mxu1 %v149_v25 }
  0x23   :  { %845 = vmatpush3.msra.mxu0 %v35_v11  ;;  %874 = vmatpush3.msra.mxu1 %v149_v25  ;;  %v367_v25 = vld [vmem:[#allocation2 + $0x190] sm:$0xff] }
  0x24   :  { %846 = vmatprep.subr.mxu0 %v34_v12  ;;  %875 = vmatprep.subr.mxu1 %v148_v26 }
  0x25   :  { %847 = vmatpush3.msra.mxu0 %v34_v12  ;;  %876 = vmatpush3.msra.mxu1 %v148_v26  ;;  %v380_v12 = vld [vmem:[#allocation2 + $0x1f8] sm:$0xff]  ;;  %v366_v26 = vld [vmem:[#allocation2 + $0x188] sm:$0xff] }
  0x26   :  { %848 = vmatprep.subr.mxu0 %v33_v13  ;;  %877 = vmatprep.subr.mxu1 %v147_v27 }
  0x27   :  { %849 = vmatpush3.msra.mxu0 %v33_v13  ;;  %878 = vmatpush3.msra.mxu1 %v147_v27  ;;  %v379_v13 = vld [vmem:[#allocation2 + $0x1f0] sm:$0xff]  ;;  %v365_v27 = vld [vmem:[#allocation2 + $0x180] sm:$0xff] }
  0x28   :  { %850 = vmatprep.subr.mxu0 %v32_v14  ;;  %879 = vmatprep.subr.mxu1 %v146_v28 }
  0x29   :  { %851 = vmatpush3.msra.mxu0 %v32_v14  ;;  %880 = vmatpush3.msra.mxu1 %v146_v28  ;;  %v378_v14 = vld [vmem:[#allocation2 + $0x1e8] sm:$0xff]  ;;  %v703_v28 = vld [vmem:[%s1157_s2 + $0x2] ss:$0 sm:$0xff] }
  0x2a   :  { %852 = vmatprep.subr.mxu0 %v31_v15  ;;  %881 = vmatprep.subr.mxu1 %v145_v29 }
  0x2b   :  { %853 = vmatpush3.msra.mxu0 %v31_v15  ;;  %882 = vmatpush3.msra.mxu1 %v145_v29  ;;  %v377_v15 = vld [vmem:[#allocation2 + $0x1e0] sm:$0xff] }
  0x2c   :  { %854 = vmatprep.subr.mxu0 %v30_v16  ;;  %883 = vmatprep.subr.mxu1 %v144_v30 }
  0x2d   :  { %855 = vmatpush3.msra.mxu0 %v30_v16  ;;  %884 = vmatpush3.msra.mxu1 %v144_v30  ;;  %v376_v16 = vld [vmem:[#allocation2 + $0x1d8] sm:$0xff] }
  0x2e   :  { %857 = vmatmul.mubr.f32.vlgmr.msra.gmra.mxu0 %v29_v17  ;;  %885 = vmatprep.subr.mxu1 %v143_v31  ;;  %v375_v17 = vld [vmem:[#allocation2 + $0x1d0] sm:$0xff] }
  0x2f   :  { %886 = vmatpush3.msra.mxu1 %v143_v31  ;;  %894 = vmatprep.subr.mxu0 %v268_v47 }
  0x30   :  { %887 = vmatprep.subr.mxu1 %v142_v32  ;;  %895 = vmatpush3.msra.mxu0 %v268_v47  ;;  %v486_v47 = vld [vmem:[#allocation2 + $0x248] sm:$0xff] }
  0x31   :  { %888 = vmatpush3.msra.mxu1 %v142_v32  ;;  %896 = vmatprep.subr.mxu0 %v267_v48 }
  0x32   :  { %889 = vmatprep.subr.mxu1 %v141_v33  ;;  %897 = vmatpush3.msra.mxu0 %v267_v48  ;;  %v485_v48 = vld [vmem:[#allocation2 + $0x240] sm:$0xff] }
  0x33   :  { %890 = vmatpush3.msra.mxu1 %v141_v33  ;;  %898 = vmatprep.subr.mxu0 %v266_v49 }
  0x34   :  { %899 = vmatpush3.msra.mxu0 %v266_v49  ;;  %929 = vmatprep.subr.mxu1 %v380_v12  ;;  %v484_v49 = vld [vmem:[#allocation2 + $0x238] sm:$0xff] }
  0x35   :  { %900 = vmatprep.subr.mxu0 %v265_v50 }
  0x36   :  { %901 = vmatpush3.msra.mxu0 %v265_v50  ;;  %v483_v50 = vld [vmem:[#allocation2 + $0x230] sm:$0xff] }
  0x37   :  { %902 = vmatprep.subr.mxu0 %v264_v51 }
  0x38   :  { %903 = vmatpush3.msra.mxu0 %v264_v51  ;;  %v482_v51 = vld [vmem:[#allocation2 + $0x228] sm:$0xff] }
  0x39   :  { %904 = vmatprep.subr.mxu0 %v263_v52 }
  0x3a   :  { %905 = vmatpush3.msra.mxu0 %v263_v52  ;;  %v481_v52 = vld [vmem:[#allocation2 + $0x220] sm:$0xff] }
  0x3b   :  { %906 = vmatprep.subr.mxu0 %v262_v53 }
  0x3c   :  { %907 = vmatpush3.msra.mxu0 %v262_v53  ;;  %v480_v53 = vld [vmem:[#allocation2 + $0x218] sm:$0xff] }
  0x3d   :  { %908 = vmatprep.subr.mxu0 %v261_v54 }
  0x3e   :  { %909 = vmatpush3.msra.mxu0 %v261_v54  ;;  %v479_v54 = vld [vmem:[#allocation2 + $0x210] sm:$0xff] }
  0x3f   :  { %910 = vmatprep.subr.mxu0 %v260_v55 }
  0x40   :  { %911 = vmatpush3.msra.mxu0 %v260_v55  ;;  %v478_v55 = vld [vmem:[#allocation2 + $0x208] sm:$0xff] }
  0x41   :  { %912 = vmatprep.subr.mxu0 %v259_v56 }
  0x42   :  { %913 = vmatpush3.msra.mxu0 %v259_v56  ;;  %v477_v56 = vld [vmem:[#allocation2 + $0x200] sm:$0xff] }
  0x43   :  { %914 = vmatprep.subr.mxu0 %v258_v57 }
  0x44   :  { %915 = vmatpush3.msra.mxu0 %v258_v57  ;;  %v707_v57 = vld [vmem:[%s1157_s2 + $0x3] ss:$0 sm:$0xff] }
  0x45   :  { %916 = vmatprep.subr.mxu0 %v257_v58 }
  0x46   :  { %917 = vmatpush3.msra.mxu0 %v257_v58 }
  0x47   :  { %918 = vmatprep.subr.mxu0 %v256_v59 }
  0x48   :  { %919 = vmatpush3.msra.mxu0 %v256_v59 }
  0x49   :  { %920 = vmatprep.subr.mxu0 %v255_v60 }
  0x4a   :  { %921 = vmatpush3.msra.mxu0 %v255_v60 }
  0x4b   :  { %922 = vmatprep.subr.mxu0 %v254_v61 }
  0x4c   :  { %923 = vmatpush3.msra.mxu0 %v254_v61 }
  0x4d   :  { %924 = vmatprep.subr.mxu0 %v253_v62 }
  0x4e   :  { %925 = vmatpush3.msra.mxu0 %v253_v62 }
  0xee   :  { %v858_v35 = vpop.f32.mrf.mxu0 }
  0xef   :  { %v125_v36 = vadd.f32 %v858_v35, %v695_v34 }
  0xf0   :  { %v119_v37 = vpop.f32.mrf.mxu0 }
  0xf1   :  { %v697_v38 = vmul.f32 -1.442695, %v125_v36  ;;  %v120_v39 = vadd.f32 %v695_v34, %v119_v37 }
  0xf3   :  { %1037 = vpow2.f32 %v697_v38  ;;  %v696_v40 = vmul.f32 -1.442695, %v120_v39 }
  0xf5   :  { %1039 = vpow2.f32 %v696_v40 }
 0x100   :  { %v1038_v41 = vpop.eup %1037 }
 0x101   :  { %v135_v43 = vadd.f32 1.0, %v1038_v41  ;;  %v492_v41 = vld [vmem:[#allocation2 + $0x278] sm:$0xff] }
 0x102   :  { %v1040_v42 = vpop.eup %1039  ;;  %964 = vmatprep.subr.mxu0 %v492_v41 }
 0x103   :  { %v134_v44 = vadd.f32 1.0, %v1040_v42  ;;  %v491_v42 = vld [vmem:[#allocation2 + $0x270] sm:$0xff] }
 0x105   :  { %1041 = vrcp.f32 %v134_v44  ;;  %v489_v44 = vld [vmem:[#allocation2 + $0x260] sm:$0xff] }
 0x106   :  { %1043 = vrcp.f32 %v135_v43  ;;  %v490_v43 = vld [vmem:[#allocation2 + $0x268] sm:$0xff] }
 0x112   :  { %v1042_v45 = vpop.eup %1041 }
 0x113   :  { %v1044_v46 = vpop.eup %1043  ;;  %891 = vmatprep.mubr.f32.mxu1 %v1042_v45  ;;  %v488_v45 = vld [vmem:[#allocation2 + $0x258] sm:$0xff] }
 0x114   :  { %892 = vmatmul.mubr.f32.vlgmr.msra.gmra.mxu1 %v1044_v46  ;;  %v487_v46 = vld [vmem:[#allocation2 + $0x250] sm:$0xff] }
 0x115   :  { %930 = vmatpush3.msra.mxu1 %v380_v12  ;;  %v598_v12 = vld [vmem:[#allocation2 + $0x2c8] sm:$0xff] }
 0x116   :  { %931 = vmatprep.subr.mxu1 %v379_v13 }
 0x117   :  { %932 = vmatpush3.msra.mxu1 %v379_v13  ;;  %v597_v13 = vld [vmem:[#allocation2 + $0x2c0] sm:$0xff] }
 0x118   :  { %933 = vmatprep.subr.mxu1 %v378_v14 }
 0x119   :  { %934 = vmatpush3.msra.mxu1 %v378_v14  ;;  %v596_v14 = vld [vmem:[#allocation2 + $0x2b8] sm:$0xff] }
 0x11a   :  { %935 = vmatprep.subr.mxu1 %v377_v15 }
 0x11b   :  { %936 = vmatpush3.msra.mxu1 %v377_v15  ;;  %v595_v15 = vld [vmem:[#allocation2 + $0x2b0] sm:$0xff] }
 0x11c   :  { %937 = vmatprep.subr.mxu1 %v376_v16 }
 0x11d   :  { %938 = vmatpush3.msra.mxu1 %v376_v16  ;;  %v594_v16 = vld [vmem:[#allocation2 + $0x2a8] sm:$0xff] }
 0x11e   :  { %939 = vmatprep.subr.mxu1 %v375_v17 }
 0x11f   :  { %940 = vmatpush3.msra.mxu1 %v375_v17  ;;  %v593_v17 = vld [vmem:[#allocation2 + $0x2a0] sm:$0xff] }
 0x120   :  { %941 = vmatprep.subr.mxu1 %v374_v18 }
 0x121   :  { %942 = vmatpush3.msra.mxu1 %v374_v18  ;;  %v592_v18 = vld [vmem:[#allocation2 + $0x298] sm:$0xff] }
 0x122   :  { %943 = vmatprep.subr.mxu1 %v373_v19 }
 0x123   :  { %944 = vmatpush3.msra.mxu1 %v373_v19  ;;  %v591_v19 = vld [vmem:[#allocation2 + $0x290] sm:$0xff] }
 0x124   :  { %945 = vmatprep.subr.mxu1 %v372_v20 }
 0x125   :  { %946 = vmatpush3.msra.mxu1 %v372_v20  ;;  %v590_v20 = vld [vmem:[#allocation2 + $0x288] sm:$0xff] }
 0x126   :  { %947 = vmatprep.subr.mxu1 %v371_v21 }
 0x127   :  { %948 = vmatpush3.msra.mxu1 %v371_v21  ;;  %v589_v21 = vld [vmem:[#allocation2 + $0x280] sm:$0xff] }
 0x128   :  { %949 = vmatprep.subr.mxu1 %v370_v22 }
 0x129   :  { %950 = vmatpush3.msra.mxu1 %v370_v22  ;;  %v711_v22 = vld [vmem:[%s1157_s2 + $0x4] ss:$0 sm:$0xff] }
 0x12a   :  { %951 = vmatprep.subr.mxu1 %v369_v23 }
 0x12b   :  { %952 = vmatpush3.msra.mxu1 %v369_v23 }
 0x12c   :  { %953 = vmatprep.subr.mxu1 %v368_v24 }
 0x12d   :  { %954 = vmatpush3.msra.mxu1 %v368_v24 }
 0x12e   :  { %955 = vmatprep.subr.mxu1 %v367_v25 }
 0x12f   :  { %956 = vmatpush3.msra.mxu1 %v367_v25 }
 0x130   :  { %957 = vmatprep.subr.mxu1 %v366_v26 }
 0x131   :  { %958 = vmatpush3.msra.mxu1 %v366_v26 }
 0x132   :  { %959 = vmatprep.subr.mxu1 %v365_v27 }
 0x133   :  { %960 = vmatpush3.msra.mxu1 %v365_v27 }
 0x1d4   :  { %v893_v0 = vpop.f32.mrf.mxu1 }
 0x1d5   :  { %v237_v1 = vadd.f32 %v893_v0, %v699_v63 }
 0x1d6   :  { %v231_v2 = vpop.f32.mrf.mxu1 }
 0x1d7   :  { %v701_v3 = vmul.f32 -1.442695, %v237_v1  ;;  %v232_v4 = vadd.f32 %v699_v63, %v231_v2 }
 0x1d9   :  { %1045 = vpow2.f32 %v701_v3  ;;  %v700_v5 = vmul.f32 -1.442695, %v232_v4 }
 0x1db   :  { %1047 = vpow2.f32 %v700_v5 }
 0x1e6   :  { %v1046_v6 = vpop.eup %1045 }
 0x1e7   :  { %v247_v8 = vadd.f32 1.0, %v1046_v6  ;;  %v604_v6 = vld [vmem:[#allocation2 + $0x2f8] sm:$0xff] }
 0x1e8   :  { %v1048_v7 = vpop.eup %1047  ;;  %999 = vmatprep.subr.mxu1 %v604_v6 }
 0x1e9   :  { %v246_v9 = vadd.f32 1.0, %v1048_v7  ;;  %v603_v7 = vld [vmem:[#allocation2 + $0x2f0] sm:$0xff] }
 0x1eb   :  { %1049 = vrcp.f32 %v246_v9  ;;  %v601_v9 = vld [vmem:[#allocation2 + $0x2e0] sm:$0xff] }
 0x1ec   :  { %1051 = vrcp.f32 %v247_v8  ;;  %v602_v8 = vld [vmem:[#allocation2 + $0x2e8] sm:$0xff] }
 0x1f8   :  { %v1050_v10 = vpop.eup %1049 }
 0x1f9   :  { %v1052_v11 = vpop.eup %1051  ;;  %926 = vmatprep.mubr.f32.mxu0 %v1050_v10  ;;  %v600_v10 = vld [vmem:[#allocation2 + $0x2d8] sm:$0xff] }
 0x1fa   :  { %927 = vmatmul.mubr.f32.vlgmr.msra.gmra.mxu0 %v1052_v11  ;;  %v599_v11 = vld [vmem:[#allocation2 + $0x2d0] sm:$0xff] }
 0x1fb   :  { %965 = vmatpush3.msra.mxu0 %v492_v41 }
 0x1fc   :  { %966 = vmatprep.subr.mxu0 %v491_v42 }
 0x1fd   :  { %967 = vmatpush3.msra.mxu0 %v491_v42 }
 0x1fe   :  { %968 = vmatprep.subr.mxu0 %v490_v43 }
 0x1ff   :  { %969 = vmatpush3.msra.mxu0 %v490_v43 }
 0x200   :  { %970 = vmatprep.subr.mxu0 %v489_v44 }
 0x201   :  { %971 = vmatpush3.msra.mxu0 %v489_v44 }
 0x202   :  { %972 = vmatprep.subr.mxu0 %v488_v45 }
 0x203   :  { %973 = vmatpush3.msra.mxu0 %v488_v45 }
 0x204   :  { %974 = vmatprep.subr.mxu0 %v487_v46 }
 0x205   :  { %975 = vmatpush3.msra.mxu0 %v487_v46 }
 0x206   :  { %976 = vmatprep.subr.mxu0 %v486_v47 }
 0x207   :  { %977 = vmatpush3.msra.mxu0 %v486_v47 }
 0x208   :  { %978 = vmatprep.subr.mxu0 %v485_v48 }
 0x209   :  { %979 = vmatpush3.msra.mxu0 %v485_v48 }
 0x20a   :  { %980 = vmatprep.subr.mxu0 %v484_v49 }
 0x20b   :  { %981 = vmatpush3.msra.mxu0 %v484_v49 }
 0x20c   :  { %982 = vmatprep.subr.mxu0 %v483_v50 }
 0x20d   :  { %983 = vmatpush3.msra.mxu0 %v483_v50 }
 0x20e   :  { %984 = vmatprep.subr.mxu0 %v482_v51 }
 0x20f   :  { %985 = vmatpush3.msra.mxu0 %v482_v51 }
 0x210   :  { %986 = vmatprep.subr.mxu0 %v481_v52 }
 0x211   :  { %987 = vmatpush3.msra.mxu0 %v481_v52 }
 0x212   :  { %988 = vmatprep.subr.mxu0 %v480_v53 }
 0x213   :  { %989 = vmatpush3.msra.mxu0 %v480_v53 }
 0x214   :  { %990 = vmatprep.subr.mxu0 %v479_v54 }
 0x215   :  { %991 = vmatpush3.msra.mxu0 %v479_v54 }
 0x216   :  { %992 = vmatprep.subr.mxu0 %v478_v55 }
 0x217   :  { %993 = vmatpush3.msra.mxu0 %v478_v55 }
 0x218   :  { %994 = vmatprep.subr.mxu0 %v477_v56 }
 0x219   :  { %995 = vmatpush3.msra.mxu0 %v477_v56 }
 0x2ba   :  { %v928_v29 = vpop.f32.mrf.mxu0 }
 0x2bb   :  { %v349_v30 = vadd.f32 %v928_v29, %v703_v28 }
 0x2bc   :  { %v343_v31 = vpop.f32.mrf.mxu0 }
 0x2bd   :  { %v705_v32 = vmul.f32 -1.442695, %v349_v30  ;;  %v344_v33 = vadd.f32 %v703_v28, %v343_v31 }
 0x2bf   :  { %1053 = vpow2.f32 %v705_v32  ;;  %v704_v34 = vmul.f32 -1.442695, %v344_v33 }
 0x2c1   :  { %1055 = vpow2.f32 %v704_v34 }
 0x2cc   :  { %v1054_v35 = vpop.eup %1053 }
 0x2cd   :  { %v359_v37 = vadd.f32 1.0, %v1054_v35  ;;  %v715_v35 = vld [vmem:[%s1157_s2 + $0x5] ss:$0 sm:$0xff] }
 0x2ce   :  { %v1056_v36 = vpop.eup %1055 }
 0x2cf   :  { %v358_v38 = vadd.f32 1.0, %v1056_v36 }
 0x2d1   :  { %1057 = vrcp.f32 %v358_v38 }
 0x2d2   :  { %1059 = vrcp.f32 %v359_v37 }
 0x2de   :  { %v1058_v39 = vpop.eup %1057 }
 0x2df   :  { %v1060_v40 = vpop.eup %1059  ;;  %961 = vmatprep.mubr.f32.mxu1 %v1058_v39 }
 0x2e0   :  { %962 = vmatmul.mubr.f32.vlgmr.msra.gmra.mxu1 %v1060_v40 }
 0x2e1   :  { %1000 = vmatpush3.msra.mxu1 %v604_v6 }
 0x2e2   :  { %1001 = vmatprep.subr.mxu1 %v603_v7 }
 0x2e3   :  { %1002 = vmatpush3.msra.mxu1 %v603_v7 }
 0x2e4   :  { %1003 = vmatprep.subr.mxu1 %v602_v8 }
 0x2e5   :  { %1004 = vmatpush3.msra.mxu1 %v602_v8 }
 0x2e6   :  { %1005 = vmatprep.subr.mxu1 %v601_v9 }
 0x2e7   :  { %1006 = vmatpush3.msra.mxu1 %v601_v9 }
 0x2e8   :  { %1007 = vmatprep.subr.mxu1 %v600_v10 }
 0x2e9   :  { %1008 = vmatpush3.msra.mxu1 %v600_v10 }
 0x2ea   :  { %1009 = vmatprep.subr.mxu1 %v599_v11 }
 0x2eb   :  { %1010 = vmatpush3.msra.mxu1 %v599_v11 }
 0x2ec   :  { %1011 = vmatprep.subr.mxu1 %v598_v12 }
 0x2ed   :  { %1012 = vmatpush3.msra.mxu1 %v598_v12 }
 0x2ee   :  { %1013 = vmatprep.subr.mxu1 %v597_v13 }
 0x2ef   :  { %1014 = vmatpush3.msra.mxu1 %v597_v13 }
 0x2f0   :  { %1015 = vmatprep.subr.mxu1 %v596_v14 }
 0x2f1   :  { %1016 = vmatpush3.msra.mxu1 %v596_v14 }
 0x2f2   :  { %1017 = vmatprep.subr.mxu1 %v595_v15 }
 0x2f3   :  { %1018 = vmatpush3.msra.mxu1 %v595_v15 }
 0x2f4   :  { %1019 = vmatprep.subr.mxu1 %v594_v16 }
 0x2f5   :  { %1020 = vmatpush3.msra.mxu1 %v594_v16 }
 0x2f6   :  { %1021 = vmatprep.subr.mxu1 %v593_v17 }
 0x2f7   :  { %1022 = vmatpush3.msra.mxu1 %v593_v17 }
 0x2f8   :  { %1023 = vmatprep.subr.mxu1 %v592_v18 }
 0x2f9   :  { %1024 = vmatpush3.msra.mxu1 %v592_v18 }
 0x2fa   :  { %1025 = vmatprep.subr.mxu1 %v591_v19 }
 0x2fb   :  { %1026 = vmatpush3.msra.mxu1 %v591_v19 }
 0x2fc   :  { %1027 = vmatprep.subr.mxu1 %v590_v20 }
 0x2fd   :  { %1028 = vmatpush3.msra.mxu1 %v590_v20 }
 0x2fe   :  { %1029 = vmatprep.subr.mxu1 %v589_v21 }
 0x2ff   :  { %1030 = vmatpush3.msra.mxu1 %v589_v21 }
 0x3a0   :  { %v963_v58 = vpop.f32.mrf.mxu1 }
 0x3a1   :  { %v461_v59 = vadd.f32 %v963_v58, %v707_v57 }
 0x3a2   :  { %v455_v60 = vpop.f32.mrf.mxu1 }
 0x3a3   :  { %v709_v61 = vmul.f32 -1.442695, %v461_v59  ;;  %v456_v62 = vadd.f32 %v707_v57, %v455_v60 }
 0x3a5   :  { %1061 = vpow2.f32 %v709_v61  ;;  %v708_v63 = vmul.f32 -1.442695, %v456_v62 }
 0x3a7   :  { %1063 = vpow2.f32 %v708_v63 }
 0x3b2   :  { %v1062_v0 = vpop.eup %1061 }
 0x3b3   :  { %v471_v2 = vadd.f32 1.0, %v1062_v0 }
 0x3b4   :  { %v1064_v1 = vpop.eup %1063 }
 0x3b5   :  { %v470_v3 = vadd.f32 1.0, %v1064_v1 }
 0x3b7   :  { %1065 = vrcp.f32 %v470_v3 }
 0x3b8   :  { %1067 = vrcp.f32 %v471_v2 }
 0x3c4   :  { %v1066_v4 = vpop.eup %1065 }
 0x3c5   :  { %v1068_v5 = vpop.eup %1067  ;;  %996 = vmatprep.mubr.f32.mxu0 %v1066_v4 }
 0x3c6   :  { %997 = vmatmul.mubr.f32.vlgmr.msra.gmra.mxu0 %v1068_v5 }
 0x486   :  { %v998_v23 = vpop.f32.mrf.mxu0 }
 0x487   :  { %v573_v24 = vadd.f32 %v998_v23, %v711_v22 }
 0x488   :  { %v567_v25 = vpop.f32.mrf.mxu0 }
 0x489   :  { %v713_v26 = vmul.f32 -1.442695, %v573_v24  ;;  %v568_v27 = vadd.f32 %v711_v22, %v567_v25 }
 0x48b   :  { %1069 = vpow2.f32 %v713_v26  ;;  %v712_v28 = vmul.f32 -1.442695, %v568_v27 }
 0x48d   :  { %1071 = vpow2.f32 %v712_v28 }
 0x498   :  { %v1070_v29 = vpop.eup %1069 }
 0x499   :  { %v583_v31 = vadd.f32 1.0, %v1070_v29 }
 0x49a   :  { %v1072_v30 = vpop.eup %1071 }
 0x49b   :  { %v582_v32 = vadd.f32 1.0, %v1072_v30 }
 0x49d   :  { %1073 = vrcp.f32 %v582_v32 }
 0x49e   :  { %1075 = vrcp.f32 %v583_v31 }
 0x4aa   :  { %v1074_v33 = vpop.eup %1073 }
 0x4ab   :  { %v1076_v34 = vpop.eup %1075  ;;  %1031 = vmatprep.mubr.f32.mxu1 %v1074_v33 }
 0x4ac   :  { %1032 = vmatmul.mubr.f32.vlgmr.msra.gmra.mxu1 %v1076_v34 }
 0x56c   :  { %v1033_v36 = vpop.f32.mrf.mxu1 }
 0x56d   :  { %v685_v37 = vadd.f32 %v1033_v36, %v715_v35 }
 0x56e   :  { %v679_v38 = vpop.f32.mrf.mxu1 }
 0x56f   :  { %689 = vst [vmem:[%s1158_s3 + $0x8] sm:$0xff] %v685_v37  ;;  %v680_v39 = vadd.f32 %v715_v35, %v679_v38 }
 0x571   :  { %688 = vst [vmem:[%s1158_s3] sm:$0xff] %v680_v39 }
 0x572   :  { %694 = vsyncpa [#allocation3], 1 }

</bundles_post_ra>
